<compile_context>
chip_gen: v5e
topology: v5e:2x2
jax: 0.10.0
libtpu: 0.0.40
codegen_flags: <defaults>
</compile_context>

<pallas_src>
import functools

import jax
import jax.numpy as jnp
from jax.experimental import pallas as pl
from jax.experimental.pallas import tpu as pltpu


def _round_up(n, m):
    return ((n + m - 1) // m) * m


def _choose_tb(B, F, tb_req):
    """Pick the batch tile (all Python ints; shapes are static under jit)."""
    # Cap so the double-buffered f32 x block fits v5e's 16 MiB default scoped
    # VMEM with headroom for the resident bf16 w1, biases and the output row.
    budget = 12 * 1024 * 1024
    cap = max(128, (budget // (2 * F * 4)) // 128 * 128)
    tb = max(128, min(_round_up(tb_req, 128), cap))
    if B > tb:
        return tb                       # grid = cdiv(B, tb) >= 2 automatically
    if B > 256:
        # Batch fits a single tile but is big enough to split: use two grid
        # steps so both v7x TensorCores participate (no-op on v5e/v6e).
        half = _round_up(pl.cdiv(B, 2), 128)
        if half < B:
            return half
    return B                            # tiny batch: one full-batch block


def _fc_head_kernel(x_ref, w1_ref, b1_ref, w2_ref, b2_ref, o_ref):
    # Hidden layer: x streamed in its source dtype, cast to bf16 in-register
    # (hidden under DMA slack), MXU matmul with f32 accumulate.
    x = x_ref[...].astype(jnp.bfloat16)
    w1 = w1_ref[...].astype(jnp.bfloat16)            # no-op when pre-cast
    h = jnp.dot(x, w1, preferred_element_type=jnp.float32)      # (TB, Hp)
    h = jnp.maximum(h + b1_ref[...], 0.0)
    # Final Linear(Hp, 1), produced lane-dense as a (1, TB) row: contract the
    # Hp axis of h against the w2 row (tiny M=1 matmul; MXU has huge slack).
    z = jax.lax.dot_general(
        w2_ref[...], h,
        dimension_numbers=(((1,), (1,)), ((), ())),
        preferred_element_type=jnp.float32)                     # (1, TB)
    z = z + b2_ref[0, 0]                                        # SMEM scalar bias
    # Sigmoid: exp + exact reciprocal both land on the EUP slot.
    o_ref[...] = pl.reciprocal(1.0 + jnp.exp(-z), approx=False)


@functools.partial(jax.jit, static_argnames=("tb",))
def base_classifier_fc(x, w1, b1, w2_row, b2, *, tb=512):
    """Pallas forward of BaseClassifier.fc: Linear(F,H)->ReLU->Linear(H,1)->Sigmoid.

    x      : (B, F)  pooled backbone features (f32 or bf16; cast to bf16 in-kernel)
    w1     : (F, Hp) first Linear weight, Hp = hidden padded to 128 lanes (pre-cast bf16)
    b1     : (1, Hp) first Linear bias (f32, padded cols zero)
    w2_row : (1, Hp) final Linear weight as a row (f32, padded cols zero)
    b2     : (1, 1)  final Linear bias (f32; lives in SMEM)
    returns (B, 1) sigmoid probabilities, float32.
    """
    B, F = x.shape
    Hp = w1.shape[1]

    tb_eff = _choose_tb(B, F, tb)
    grid = (pl.cdiv(B, tb_eff),)        # ragged tail handled by Pallas edge blocks

    out = pl.pallas_call(
        _fc_head_kernel,
        out_shape=jax.ShapeDtypeStruct((1, B), jnp.float32),    # lane-dense row
        grid=grid,
        in_specs=[
            pl.BlockSpec((tb_eff, F), lambda i: (i, 0)),        # x: streamed
            pl.BlockSpec((F, Hp), lambda i: (0, 0)),            # w1: VMEM-resident
            pl.BlockSpec((1, Hp), lambda i: (0, 0)),            # b1: resident
            pl.BlockSpec((1, Hp), lambda i: (0, 0)),            # w2 row: resident
            pl.BlockSpec((1, 1), lambda i: (0, 0),
                         memory_space=pltpu.MemorySpace.SMEM),  # b2: SMEM scalar
        ],
        out_specs=pl.BlockSpec((1, tb_eff), lambda i: (0, i)),
        compiler_params=pltpu.CompilerParams(
            dimension_semantics=("parallel",)),
        cost_estimate=pl.CostEstimate(
            flops=2 * B * F * Hp + 2 * B * Hp,
            transcendentals=B,
            bytes_accessed=(B * F * x.dtype.itemsize
                            + F * Hp * w1.dtype.itemsize
                            + 2 * Hp * 4 + 4 + B * 4)),
    )(x, w1, b1, w2_row, b2)
    return out.reshape(B, 1)


def init_params(key, feature_dim, hidden_dim, hidden_pad):
    """torch.nn.Linear-style U(-1/sqrt(fan_in), +) init; hidden padded to 128 lanes.

    Weights are constants across calls, so the padding and the bf16 cast of w1
    happen ONCE here rather than per call inside the jitted wrapper.
    """
    k1, k2, k3, k4 = jax.random.split(key, 4)
    lim1 = 1.0 / jnp.sqrt(feature_dim)
    lim2 = 1.0 / jnp.sqrt(hidden_dim)
    w1 = jax.random.uniform(k1, (feature_dim, hidden_dim), jnp.float32, -lim1, lim1)
    b1 = jax.random.uniform(k2, (hidden_dim,), jnp.float32, -lim1, lim1)
    w2 = jax.random.uniform(k3, (hidden_dim, 1), jnp.float32, -lim2, lim2)
    b2 = jax.random.uniform(k4, (1,), jnp.float32, -lim2, lim2)
    # Zero-pad hidden 100 -> 128: padded cols have zero weight/bias, so ReLU
    # output there is 0 and the final layer is unaffected.
    w1p = (jnp.zeros((feature_dim, hidden_pad), jnp.float32)
           .at[:, :hidden_dim].set(w1).astype(jnp.bfloat16))
    b1p = jnp.zeros((1, hidden_pad), jnp.float32).at[0, :hidden_dim].set(b1)
    w2p = jnp.zeros((1, hidden_pad), jnp.float32).at[0, :hidden_dim].set(w2[:, 0])
    b2p = b2.reshape(1, 1)
    return w1p, b1p, w2p, b2p, (w1, b1, w2, b2)


if __name__ == "__main__":
    key = jax.random.PRNGKey(0)
    kx1, kx2, kp = jax.random.split(key, 3)

    FEATURE_DIM = 256  # small stand-in for the resnet feature_map_dim (e.g. 2048)
    HIDDEN = 100       # hidden_layers=[100] as in the module default
    HIDDEN_PAD = 128   # lane-aligned padding of the hidden dim

    w1p, b1p, w2p, b2p, (w1, b1, w2, b2) = init_params(kp, FEATURE_DIM, HIDDEN, HIDDEN_PAD)

    def torch_ref(x):
        # Pure-JAX f32 reference of the unpadded fc head.
        h = jnp.maximum(x @ w1 + b1, 0.0)
        return jax.nn.sigmoid(h @ w2 + b2)

    # 1) Tiny batch: single full-batch block.
    x_small = jax.random.normal(kx1, (8, FEATURE_DIM), jnp.float32)
    out_small = jax.block_until_ready(base_classifier_fc(x_small, w1p, b1p, w2p, b2p))
    assert out_small.shape == (8, 1), out_small.shape
    # bf16 first matmul => relaxed tolerance vs f32 ref.
    assert jnp.allclose(out_small, torch_ref(x_small), atol=2e-2, rtol=2e-2)

    # 2) Batch exercising the tiled path + ragged edge block (300 = 256 + 44),
    #    with no host-side pad of x.
    x_big = jax.random.normal(kx2, (300, FEATURE_DIM), jnp.float32)
    out_big = jax.block_until_ready(base_classifier_fc(x_big, w1p, b1p, w2p, b2p))
    assert out_big.shape == (300, 1), out_big.shape
    assert jnp.allclose(out_big, torch_ref(x_big), atol=2e-2, rtol=2e-2)

    print("KERNEL_OK")
</pallas_src>

<mosaic_0001>
module attributes {stable_mosaic.version = 11 : i64} {
  func.func @_fc_head_kernel(%arg0: i32, %arg1: memref<8x256xf32, #tpu.memory_space<vmem>>, %arg2: memref<256x128xbf16, #tpu.memory_space<vmem>>, %arg3: memref<1x128xf32, #tpu.memory_space<vmem>>, %arg4: memref<1x128xf32, #tpu.memory_space<vmem>>, %arg5: memref<1x1xf32, #tpu.memory_space<smem>>, %arg6: memref<1x8xf32, #tpu.memory_space<vmem>>) attributes {dimension_semantics = [#tpu.dimension_semantics<parallel>], iteration_bounds = array<i64: 1>, scalar_prefetch = 0 : i64, scratch_operands = 0 : i64, tpu.core_type = #tpu.core_type<tc>, window_params = [{transform_indices = @transform_0, window_bounds = array<i64: 8, 256>}, {pipeline_mode = #tpu.pipeline_mode<synchronous>, transform_indices = @transform_1, window_bounds = array<i64: 256, 128>}, {pipeline_mode = #tpu.pipeline_mode<synchronous>, transform_indices = @transform_2, window_bounds = array<i64: 1, 128>}, {pipeline_mode = #tpu.pipeline_mode<synchronous>, transform_indices = @transform_3, window_bounds = array<i64: 1, 128>}, {transform_indices = @transform_4, window_bounds = array<i64: 1, 1>}, {transform_indices = @transform_5, window_bounds = array<i64: 1, 8>}]} {
    %c0 = arith.constant 0 : index
    %c0_0 = arith.constant 0 : index
    %0 = vector.load %arg1[%c0, %c0_0] : memref<8x256xf32, #tpu.memory_space<vmem>>, vector<8x256xf32>
    %1 = arith.truncf %0 : vector<8x256xf32> to vector<8x256xbf16>
    %c0_1 = arith.constant 0 : index
    %c0_2 = arith.constant 0 : index
    %2 = vector.load %arg2[%c0_1, %c0_2] : memref<256x128xbf16, #tpu.memory_space<vmem>>, vector<256x128xbf16>
    %cst = arith.constant dense<0.000000e+00> : vector<8x128xf32>
    %3 = tpu.matmul %1, %2, %cst {dimension_numbers = #tpu.dot_dimension_numbers<[1], [0], [0], [1], [0, 0, 1, 1], [], []>} : vector<8x256xbf16>, vector<256x128xbf16>, vector<8x128xf32> -> vector<8x128xf32>
    %c0_3 = arith.constant 0 : index
    %c0_4 = arith.constant 0 : index
    %4 = vector.load %arg3[%c0_3, %c0_4] : memref<1x128xf32, #tpu.memory_space<vmem>>, vector<1x128xf32>
    %5 = vector.broadcast %4 : vector<1x128xf32> to vector<8x128xf32>
    %6 = arith.addf %3, %5 : vector<8x128xf32>
    %cst_5 = arith.constant 0.000000e+00 : f32
    %7 = vector.broadcast %cst_5 : f32 to vector<8x128xf32>
    %8 = arith.maximumf %6, %7 : vector<8x128xf32>
    %c0_6 = arith.constant 0 : index
    %c0_7 = arith.constant 0 : index
    %9 = vector.load %arg4[%c0_6, %c0_7] : memref<1x128xf32, #tpu.memory_space<vmem>>, vector<1x128xf32>
    %cst_8 = arith.constant dense<0.000000e+00> : vector<1x8xf32>
    %10 = tpu.matmul %9, %8, %cst_8 {dimension_numbers = #tpu.dot_dimension_numbers<[1], [1], [0], [0], [0, 0, 1, 0], [], []>} : vector<1x128xf32>, vector<8x128xf32>, vector<1x8xf32> -> vector<1x8xf32>
    %c0_9 = arith.constant 0 : index
    %c0_10 = arith.constant 0 : index
    %11 = memref.load %arg5[%c0_9, %c0_10] : memref<1x1xf32, #tpu.memory_space<smem>>
    %12 = vector.broadcast %11 : f32 to vector<1x8xf32>
    %13 = arith.addf %10, %12 : vector<1x8xf32>
    %cst_11 = arith.constant 0.000000e+00 : f32
    %14 = vector.broadcast %cst_11 : f32 to vector<1x8xf32>
    %15 = arith.subf %14, %13 : vector<1x8xf32>
    %16 = math.exp %15 : vector<1x8xf32>
    %cst_12 = arith.constant 1.000000e+00 : f32
    %17 = vector.broadcast %cst_12 : f32 to vector<1x8xf32>
    %18 = arith.addf %17, %16 : vector<1x8xf32>
    %19 = tpu.reciprocal %18 : vector<1x8xf32> -> vector<1x8xf32>
    %c0_13 = arith.constant 0 : index
    %c0_14 = arith.constant 0 : index
    %20 = vector.load %arg6[%c0_13, %c0_14] : memref<1x8xf32, #tpu.memory_space<vmem>>, vector<1x8xf32>
    tpu.vector_store %arg6[%c0_13, %c0_14], %19 {strides = array<i32>} : memref<1x8xf32, #tpu.memory_space<vmem>>, vector<1x8xf32>,
    return
  }
  func.func @transform_0(%arg0: i32) -> (i32, i32) {
    %c0_i32 = arith.constant 0 : i32
    %c0_i32_0 = arith.constant 0 : i32
    return %arg0, %c0_i32 : i32, i32
  }
  func.func @transform_1(%arg0: i32) -> (i32, i32) {
    %c0_i32 = arith.constant 0 : i32
    %c0_i32_0 = arith.constant 0 : i32
    %c0_i32_1 = arith.constant 0 : i32
    return %c0_i32, %c0_i32_0 : i32, i32
  }
  func.func @transform_2(%arg0: i32) -> (i32, i32) {
    %c0_i32 = arith.constant 0 : i32
    %c0_i32_0 = arith.constant 0 : i32
    %c0_i32_1 = arith.constant 0 : i32
    return %c0_i32, %c0_i32_0 : i32, i32
  }
  func.func @transform_3(%arg0: i32) -> (i32, i32) {
    %c0_i32 = arith.constant 0 : i32
    %c0_i32_0 = arith.constant 0 : i32
    %c0_i32_1 = arith.constant 0 : i32
    return %c0_i32, %c0_i32_0 : i32, i32
  }
  func.func @transform_4(%arg0: i32) -> (i32, i32) {
    %c0_i32 = arith.constant 0 : i32
    %c0_i32_0 = arith.constant 0 : i32
    %c0_i32_1 = arith.constant 0 : i32
    return %c0_i32, %c0_i32_0 : i32, i32
  }
  func.func @transform_5(%arg0: i32) -> (i32, i32) {
    %c0_i32 = arith.constant 0 : i32
    %c0_i32_0 = arith.constant 0 : i32
    return %c0_i32, %arg0 : i32, i32
  }
}

</mosaic_0001>

<bundles_post_ra>
// kernel: base_classifier_fc.1
= control target key start
LH: loop header
LB: loop body
LE: loop exit
PB: predicated region body
PF: predicated region fallthrough
CT: control target
= control target key end

     0   :  { %11 = vsyncpa [#allocation4], 0  ;;  %s497_s0 = inlined_call_operand.hbm [shape: f32[8,256], index: 0, kind: input, shape index: {}]   ;;  %s498_s1 = inlined_call_operand.hbm [shape: bf16[256,128], index: 1, kind: input, shape index: {}]   ;;  %s499_s2 = inlined_call_operand.vmem [shape: f32[1,128], index: 2, kind: input, shape index: {}]   ;;  %s500_s3 = inlined_call_operand.vmem [shape: f32[1,128], index: 3, kind: input, shape index: {}]   ;;  %s501_s4 = inlined_call_operand.<no memory space> [shape: f32[1,1], index: 4, kind: input, shape index: {}]   ;;  %s502_s5 = inlined_call_operand.hbm [shape: f32[1,8], index: 5, kind: output, shape index: {}]  }
   0x1   :  { %12 = vsyncpa [#allocation7], 0 }
   0x2   :  { %13 = vsyncpa [#allocation5], 0  ;;  %s19_s20 = sshll.u32 %s497_s0, 4  ;;  %s444_s21 = smov [#allocation3]   ;;  %s20_s20 = int_to_ptr.hbm [resolvable:$true] %s19_s20 }
   0x3   :  { %s21_s22 = sshll.u32 %s444_s21, 4  ;;  %s29_s25 = sshll.u32 %s498_s1, 4  ;;  %s22_s22 = int_to_ptr.vmem [resolvable:$true] %s21_s22  ;;  %s30_s25 = int_to_ptr.hbm [resolvable:$true] %s29_s25 }
   0x4   :  { %24 = dma.hbm_to_vmem [thread:$0]  %s20_s20, 256, %s22_s22, [#allocation4]  }
   0x5   :  { %s445_s26 = smov [#allocation6]   ;;  %s446_s28 = smov 64  }
   0x6   :  { %s31_s27 = sshll.u32 %s445_s26, 4  ;;  %s447_s29 = smov 4   ;;  %s32_s27 = int_to_ptr.vmem [resolvable:$true] %s31_s27 }
   0x7   :  { %37 = dma.hbm_to_vmem [thread:$0]  %s30_s25, 2048, %s32_s27, [#allocation7], %s446_s28, %s446_s28, %s447_s29  }
   0x8   :  { %438 = dma.done.wait [#allocation4], 256  }
   0x9   :  { %439 = vsyncadd [#allocation4], 4294967040 }
   0xa   :  { %440 = dma.done.wait [#allocation7], 2048  }
   0xb   :  { %441 = vsyncadd [#allocation7], 4294965248  ;;  %v347_v0 = vld [vmem:[#allocation6 + $0x38] sm:$0xff]  ;;  %v346_v2 = vld [vmem:[#allocation6 + $0x30] sm:$0xff]  ;;  %v217_v29 = vstv %s501_s4  ;;  %s265_s4 = sshll.u32 %s502_s5, 4  ;;  %vm256_vm3 = vcmask 57344   ;;  %s266_s4 = int_to_ptr.hbm [resolvable:$true] %s265_s4 }
   0xc   :  { %v355_v1 = vld [vmem:[#allocation6 + $0x78] sm:$0xff]  ;;  %188 = vmatpush.bf16.msra.mxu0 %v347_v0  ;;  %v354_v3 = vld [vmem:[#allocation6 + $0x70] sm:$0xff]  ;;  %v345_v4 = vld [vmem:[#allocation6 + $0x28] sm:$0xff] }
   0xd   :  { %201 = vmatpush.bf16.msra.mxu1 %v355_v1  ;;  %v353_v5 = vld [vmem:[#allocation6 + $0x68] sm:$0xff]  ;;  %v344_v6 = vld [vmem:[#allocation6 + $0x20] sm:$0xff]  ;;  %v343_v8 = vld [vmem:[#allocation6 + $0x18] sm:$0xff] }
   0xe   :  { %v352_v7 = vld [vmem:[#allocation6 + $0x60] sm:$0xff]  ;;  %v351_v9 = vld [vmem:[#allocation6 + $0x58] sm:$0xff]  ;;  %v342_v10 = vld [vmem:[#allocation6 + $0x10] sm:$0xff] }
   0xf   :  { %v350_v11 = vld [vmem:[#allocation6 + $0x50] sm:$0xff]  ;;  %v341_v12 = vld [vmem:[#allocation6 + $0x8] sm:$0xff]  ;;  %v340_v14 = vld [vmem:[#allocation6] sm:$0xff] }
  0x10   :  { %189 = vmatpush.bf16.msra.mxu0 %v346_v2  ;;  %v349_v13 = vld [vmem:[#allocation6 + $0x48] sm:$0xff]  ;;  %v348_v15 = vld [vmem:[#allocation6 + $0x40] sm:$0xff]  ;;  %v52_v16 = vld [vmem:[#allocation3] sm:$0xff] }
  0x11   :  { %202 = vmatpush.bf16.msra.mxu1 %v354_v3  ;;  %v53_v17 = vld [vmem:[#allocation3 + $0x8] sm:$0xff]  ;;  %v54_v18 = vpack.c.bf16 %v52_v16, %v52_v16  ;;  %v361_v20 = vld [vmem:[%s499_s2] ss:$0 sm:$0xff]  ;;  %s448_s2 = smov [#allocation8]  }
  0x12   :  { %v55_v19 = vpack.c.bf16 %v53_v17, %v53_v17  ;;  %v215_v26 = vld [vmem:[%s500_s3] sm:$0x1]  ;;  %s263_s3 = sshll.u32 %s448_s2, 4  ;;  %s264_s3 = int_to_ptr.vmem [resolvable:$true] %s263_s3 }
  0x14   :  { %190 = vmatpush.bf16.msra.mxu0 %v345_v4 }
  0x15   :  { %203 = vmatpush.bf16.msra.mxu1 %v353_v5 }
  0x18   :  { %191 = vmatpush.bf16.msra.mxu0 %v344_v6 }
  0x19   :  { %204 = vmatpush.bf16.msra.mxu1 %v352_v7 }
  0x1c   :  { %192 = vmatpush.bf16.msra.mxu0 %v343_v8 }
  0x1d   :  { %205 = vmatpush.bf16.msra.mxu1 %v351_v9 }
  0x20   :  { %193 = vmatpush.bf16.msra.mxu0 %v342_v10 }
  0x21   :  { %206 = vmatpush.bf16.msra.mxu1 %v350_v11 }
  0x24   :  { %194 = vmatpush.bf16.msra.mxu0 %v341_v12 }
  0x25   :  { %207 = vmatpush.bf16.msra.mxu1 %v349_v13 }
  0x28   :  { %195 = vmatpush.bf16.msra.mxu0 %v340_v14 }
  0x29   :  { %208 = vmatpush.bf16.msra.mxu1 %v348_v15 }
  0x2b   :  { %196 = vmatmul.bf16.vlgmr.msra.gmra.mxu0 %v54_v18 }
  0x2c   :  { %209 = vmatmul.bf16.vlgmr.msra.gmra.mxu1 %v55_v19 }
  0xa8   :  { %v197_v21 = vpop.f32.mrf.mxu0 }
  0xa9   :  { %v210_v22 = vpop.f32.mrf.mxu1  ;;  %v198_v23 = vadd.f32 %v361_v20, %v197_v21 }
  0xab   :  { %v211_v24 = vadd.f32 %v210_v22, %v198_v23 }
  0xad   :  { %v214_v25 = vmax.f32 %v211_v24, 0.0 }
  0xaf   :  { %233 = vmatpush.xpose.msra.mxu2 %v214_v25 }
  0xb0   :  { %v199_v27 = vpop.f32.mrf.mxu0 }
  0xb1   :  { %v212_v28 = vpop.f32.mrf.mxu1 }
  0xb2   :  { %234 = vmatmul.f32.vlgmr.msra.gmra.mxu2 %v215_v26 }
 0x135   :  { %v235_v30 = vpop.f32.mrf.mxu2 }
 0x136   :  { %v236_v31 = vadd.f32 %v235_v30, %v217_v29 }
 0x138   :  { %v238_v32 = vsub.f32 0.0, %v236_v31 }
 0x13a   :  { %v239_v33 = vmul.f32 1.442695, %v238_v32 }
 0x13c   :  { %362 = vpow2.f32 %v239_v33 }
 0x142   :  { %v363_v34 = vpop.eup %362 }
 0x143   :  { %v241_v35 = vadd.f32 1.0, %v363_v34 }
 0x145   :  { %364 = vrcp.f32 %v241_v35  ;;  %v253_v39 = vand.u32 2147483648, %v241_v35  ;;  %v251_v41 = vand.u32 2147483647, %v241_v35  ;;  %vm247_vm1 = vweird.f32 %v241_v35 }
 0x147   :  { %v254_v43 = vor.u32 1.1754944e-38, %v253_v39  ;;  %vm252_vm4 = vcmp.eq.f32.partialorder %v251_v41, 8.507059e+37 }
 0x14b   :  { %v365_v36 = vpop.eup %364 }
 0x14c   :  { %v243_v37 = vmul.f32 %v365_v36, %v241_v35  ;;  %vm248_vm0 = vweird.f32 %v365_v36 }
 0x14d   :  { %vm249_vm2 = vmor %vm247_vm1, %vm248_vm0 }
 0x14e   :  { %v244_v38 = vsub.f32 1.0, %v243_v37 }
 0x150   :  { %v245_v40 = vmul.f32 %v365_v36, %v244_v38 }
 0x152   :  { %v246_v42 = vadd.f32 %v365_v36, %v245_v40 }
 0x154   :  { %v250_v44 = vsel %vm249_vm2, %v365_v36, %v246_v42 }
 0x155   :  { %v255_v45 = vsel %vm252_vm4, %v254_v43, %v250_v44 }
 0x156   :  { %257 = vst.msk [vmem:[#allocation8] sm:$0x1] %vm256_vm3, %v255_v45 }
 0x157   :  { %268 = dma.vmem_to_hbm [thread:$0]  %s264_s3, 16, %s266_s4, [#allocation5]  }
 0x158   :  { %442 = dma.done.wait [#allocation5], 16  }
 0x159   :  { %443 = vsyncadd [#allocation5], 4294967280 }
 0x15a   :  { %273 = vsyncpa [#allocation4], 1 }
 0x15b   :  { %274 = vsyncpa [#allocation7], 1 }
 0x15c   :  { %275 = vsyncpa [#allocation5], 1 }

</bundles_post_ra>
